<compile_context>
chip_gen: v7x
topology: tpu7x:2x2x1
jax: 0.10.0
libtpu: 0.0.40
codegen_flags: <defaults>
</compile_context>

<pallas_src>
import jax
import jax.numpy as jnp
from jax.experimental import pallas as pl
from jax.experimental.pallas import tpu as pltpu


def _layernorm(x, eps=1e-5):
    # Single-pass moments: var = E[x^2] - mean^2 (halves the XLU reductions).
    mu = jnp.mean(x, axis=-1, keepdims=True)
    var = jnp.maximum(jnp.mean(x * x, axis=-1, keepdims=True) - mu * mu, 0.0)
    return (x - mu) * jax.lax.rsqrt(var + eps)


def _gelu(x):
    # tanh-approximate GELU (matches jax.nn.gelu default).
    c = 0.7978845608028654  # sqrt(2/pi)
    return 0.5 * x * (1.0 + jnp.tanh(c * (x + 0.044715 * x * x * x)))


def mixer_block_kernel(x_ref, w1t_ref, w2t_ref, w3_ref, w4_ref, y_ref):
    # x_ref block: (bt, S, C) float32; weights are bf16, fully resident in VMEM.
    w1t = w1t_ref[...]            # (DS, S)  bf16
    w2t = w2t_ref[...]            # (S, DS)  bf16
    w3 = w3_ref[...]              # (C, DC)  bf16
    w4 = w4_ref[...]              # (DC, C)  bf16

    bt = x_ref.shape[0]
    for i in range(bt):           # static unroll over the packed batch tile
        x = x_ref[i]              # (S, C) float32

        # ---- Token mixing ----
        xn = _layernorm(x)                                         # f32
        # transpose(gelu(xn^T @ W1) @ W2) == W2^T @ gelu(W1^T @ xn); the weight
        # transposes are hoisted to the wrapper so the kernel has no transposes.
        h = jnp.dot(w1t, xn.astype(jnp.bfloat16),
                    preferred_element_type=jnp.float32)            # (DS, C) f32
        tok = jnp.dot(w2t, _gelu(h).astype(jnp.bfloat16),
                      preferred_element_type=jnp.float32)          # (S, C) f32
        u = tok + x                                                # residual

        # ---- Channel mixing ----
        un = _layernorm(u)                                         # f32
        h2 = _gelu(jnp.dot(un.astype(jnp.bfloat16), w3,
                           preferred_element_type=jnp.float32))    # (S, DC) f32
        y = jnp.dot(h2.astype(jnp.bfloat16), w4,
                    preferred_element_type=jnp.float32) + u        # (S, C) f32

        y_ref[i] = y


def mlp_block(x, W1, W2, W3, W4, *, bt=None):
    """x: (B, S, C) float32.  W1:(S,DS) W2:(DS,S) W3:(C,DC) W4:(DC,C)."""
    B, S, C = x.shape
    DS = W1.shape[1]
    DC = W3.shape[1]

    # Pick a batch tile that divides B and keeps the x/y block a few MiB.
    if bt is None:
        bt = 1
        for cand in range(min(B, 8), 0, -1):
            if B % cand == 0 and cand * S * C * 4 <= (2 << 20):
                bt = cand
                break

    # Weight transposes + bf16 cast done once, outside the kernel.
    W1T = W1.T.astype(jnp.bfloat16)   # (DS, S)
    W2T = W2.T.astype(jnp.bfloat16)   # (S, DS)
    W3b = W3.astype(jnp.bfloat16)     # (C, DC)
    W4b = W4.astype(jnp.bfloat16)     # (DC, C)

    # Explicit scoped-VMEM budget: bf16 weights (pipeline may double-buffer),
    # double-buffered f32 in/out blocks, plus per-step f32 intermediates,
    # with 2x headroom; clamped to 64 MiB (valid on v5e/v6e/v7x).
    weight_bytes = 2 * 2 * (DS * S + S * DS + C * DC + DC * C)
    io_bytes = 2 * 2 * 4 * bt * S * C
    inter_bytes = 4 * (DS * C + S * DC + 4 * S * C)
    vmem_limit = int(min(64 * 2**20,
                         max(4 * 2**20,
                             2 * (weight_bytes + io_bytes + inter_bytes))))

    return pl.pallas_call(
        mixer_block_kernel,
        out_shape=jax.ShapeDtypeStruct((B, S, C), jnp.float32),
        grid_spec=pltpu.PrefetchScalarGridSpec(
            num_scalar_prefetch=0,
            grid=(B // bt,),
            in_specs=[
                pl.BlockSpec((bt, S, C), lambda b: (b, 0, 0)),
                pl.BlockSpec((DS, S), lambda b: (0, 0)),
                pl.BlockSpec((S, DS), lambda b: (0, 0)),
                pl.BlockSpec((C, DC), lambda b: (0, 0)),
                pl.BlockSpec((DC, C), lambda b: (0, 0)),
            ],
            out_specs=pl.BlockSpec((bt, S, C), lambda b: (b, 0, 0)),
        ),
        compiler_params=pltpu.CompilerParams(
            dimension_semantics=("parallel",),
            vmem_limit_bytes=vmem_limit),
    )(x, W1T, W2T, W3b, W4b)


def _mm(a, b, cast_to=None):
    """Matmul helper for the reference: optional operand cast, f32 accumulate."""
    if cast_to is not None:
        a = a.astype(cast_to)
        b = b.astype(cast_to)
    return jnp.einsum('...ij,jk->...ik', a, b,
                      preferred_element_type=jnp.float32)


def mlp_block_ref(x, W1, W2, W3, W4, cast_to=None):
    """Plain-JAX reference.  cast_to=jnp.bfloat16 mirrors the kernel's
    mixed-precision matmuls; cast_to=None is the full-f32 reference."""
    xn = _layernorm(x)
    xT = jnp.swapaxes(xn, 1, 2)                                   # (B, C, S)
    u = jnp.swapaxes(_mm(_gelu(_mm(xT, W1, cast_to)), W2, cast_to), 1, 2) + x
    un = _layernorm(u)
    return _mm(_gelu(_mm(un, W3, cast_to)), W4, cast_to) + u


if __name__ == "__main__":
    B, S, C, DS, DC = 2, 8, 32, 16, 64

    key = jax.random.PRNGKey(0)
    kx, k1, k2, k3, k4 = jax.random.split(key, 5)
    x = jax.random.normal(kx, (B, S, C), dtype=jnp.float32)
    # Fan-in scaled weights (realistic magnitudes for a trained Mixer block).
    W1 = jax.random.normal(k1, (S, DS), dtype=jnp.float32) * (S ** -0.5)
    W2 = jax.random.normal(k2, (DS, S), dtype=jnp.float32) * (DS ** -0.5)
    W3 = jax.random.normal(k3, (C, DC), dtype=jnp.float32) * (C ** -0.5)
    W4 = jax.random.normal(k4, (DC, C), dtype=jnp.float32) * (DC ** -0.5)

    y = jax.block_until_ready(mlp_block(x, W1, W2, W3, W4))

    # Tight check vs. a matched-precision (bf16-operand, f32-accumulate) reference.
    y_bf16_ref = mlp_block_ref(x, W1, W2, W3, W4, cast_to=jnp.bfloat16)
    assert jnp.allclose(y, y_bf16_ref, atol=5e-3, rtol=5e-3), \
        "mismatch vs matched-precision reference"

    # Loose sanity check vs. the full-f32 reference (bf16 MXU operands only).
    y_f32_ref = mlp_block_ref(x, W1, W2, W3, W4, cast_to=None)
    assert jnp.allclose(y, y_f32_ref, atol=0.3, rtol=0.05), \
        "mismatch vs f32 reference beyond bf16 tolerance"

    print("KERNEL_OK")
</pallas_src>

<mosaic_0001>
module attributes {stable_mosaic.version = 11 : i64} {
  func.func @mixer_block_kernel(%arg0: i32, %arg1: memref<2x8x32xf32, #tpu.memory_space<vmem>>, %arg2: memref<16x8xbf16, #tpu.memory_space<vmem>>, %arg3: memref<8x16xbf16, #tpu.memory_space<vmem>>, %arg4: memref<32x64xbf16, #tpu.memory_space<vmem>>, %arg5: memref<64x32xbf16, #tpu.memory_space<vmem>>, %arg6: memref<2x8x32xf32, #tpu.memory_space<vmem>>) attributes {dimension_semantics = [#tpu.dimension_semantics<parallel>], iteration_bounds = array<i64: 1>, scalar_prefetch = 0 : i64, scratch_operands = 0 : i64, tpu.core_type = #tpu.core_type<tc>, window_params = [{transform_indices = @transform_0, window_bounds = array<i64: 2, 8, 32>}, {pipeline_mode = #tpu.pipeline_mode<synchronous>, transform_indices = @transform_1, window_bounds = array<i64: 16, 8>}, {pipeline_mode = #tpu.pipeline_mode<synchronous>, transform_indices = @transform_2, window_bounds = array<i64: 8, 16>}, {pipeline_mode = #tpu.pipeline_mode<synchronous>, transform_indices = @transform_3, window_bounds = array<i64: 32, 64>}, {pipeline_mode = #tpu.pipeline_mode<synchronous>, transform_indices = @transform_4, window_bounds = array<i64: 64, 32>}, {transform_indices = @transform_5, window_bounds = array<i64: 2, 8, 32>}]} {
    %c0 = arith.constant 0 : index
    %c0_0 = arith.constant 0 : index
    %0 = vector.load %arg2[%c0, %c0_0] : memref<16x8xbf16, #tpu.memory_space<vmem>>, vector<16x8xbf16>
    %c0_1 = arith.constant 0 : index
    %c0_2 = arith.constant 0 : index
    %1 = vector.load %arg3[%c0_1, %c0_2] : memref<8x16xbf16, #tpu.memory_space<vmem>>, vector<8x16xbf16>
    %c0_3 = arith.constant 0 : index
    %c0_4 = arith.constant 0 : index
    %2 = vector.load %arg4[%c0_3, %c0_4] : memref<32x64xbf16, #tpu.memory_space<vmem>>, vector<32x64xbf16>
    %c0_5 = arith.constant 0 : index
    %c0_6 = arith.constant 0 : index
    %3 = vector.load %arg5[%c0_5, %c0_6] : memref<64x32xbf16, #tpu.memory_space<vmem>>, vector<64x32xbf16>
    %c0_7 = arith.constant 0 : index
    %c0_8 = arith.constant 0 : index
    %c0_9 = arith.constant 0 : index
    %4 = vector.load %arg1[%c0_7, %c0_8, %c0_9] : memref<2x8x32xf32, #tpu.memory_space<vmem>>, vector<1x8x32xf32>
    %5 = vector.shape_cast %4 : vector<1x8x32xf32> to vector<8x32xf32>
    %cst = arith.constant dense<0.000000e+00> : vector<8xf32>
    %6 = vector.multi_reduction <add>, %5, %cst [1] : vector<8x32xf32> to vector<8xf32>
    %7 = vector.shape_cast %6 : vector<8xf32> to vector<8x1xf32>
    %cst_10 = arith.constant 3.200000e+01 : f32
    %8 = vector.broadcast %cst_10 : f32 to vector<8x1xf32>
    %9 = arith.divf %7, %8 : vector<8x1xf32>
    %10 = arith.mulf %5, %5 : vector<8x32xf32>
    %cst_11 = arith.constant dense<0.000000e+00> : vector<8xf32>
    %11 = vector.multi_reduction <add>, %10, %cst_11 [1] : vector<8x32xf32> to vector<8xf32>
    %12 = vector.shape_cast %11 : vector<8xf32> to vector<8x1xf32>
    %cst_12 = arith.constant 3.200000e+01 : f32
    %13 = vector.broadcast %cst_12 : f32 to vector<8x1xf32>
    %14 = arith.divf %12, %13 : vector<8x1xf32>
    %15 = arith.mulf %9, %9 : vector<8x1xf32>
    %16 = arith.subf %14, %15 : vector<8x1xf32>
    %cst_13 = arith.constant 0.000000e+00 : f32
    %17 = vector.broadcast %cst_13 : f32 to vector<8x1xf32>
    %18 = arith.maximumf %16, %17 : vector<8x1xf32>
    %19 = vector.broadcast %9 : vector<8x1xf32> to vector<8x32xf32>
    %20 = arith.subf %5, %19 : vector<8x32xf32>
    %cst_14 = arith.constant 9.99999974E-6 : f32
    %21 = vector.broadcast %cst_14 : f32 to vector<8x1xf32>
    %22 = arith.addf %18, %21 : vector<8x1xf32>
    %23 = math.rsqrt %22 : vector<8x1xf32>
    %24 = vector.broadcast %23 : vector<8x1xf32> to vector<8x32xf32>
    %25 = arith.mulf %20, %24 : vector<8x32xf32>
    %26 = arith.truncf %25 : vector<8x32xf32> to vector<8x32xbf16>
    %cst_15 = arith.constant dense<0.000000e+00> : vector<16x32xf32>
    %27 = tpu.matmul %0, %26, %cst_15 {dimension_numbers = #tpu.dot_dimension_numbers<[1], [0], [0], [1], [0, 0, 1, 1], [], []>} : vector<16x8xbf16>, vector<8x32xbf16>, vector<16x32xf32> -> vector<16x32xf32>
    %cst_16 = arith.constant 5.000000e-01 : f32
    %28 = vector.broadcast %cst_16 : f32 to vector<16x32xf32>
    %29 = arith.mulf %28, %27 : vector<16x32xf32>
    %cst_17 = arith.constant 4.471500e-02 : f32
    %30 = vector.broadcast %cst_17 : f32 to vector<16x32xf32>
    %31 = arith.mulf %30, %27 : vector<16x32xf32>
    %32 = arith.mulf %31, %27 : vector<16x32xf32>
    %33 = arith.mulf %32, %27 : vector<16x32xf32>
    %34 = arith.addf %27, %33 : vector<16x32xf32>
    %cst_18 = arith.constant 0.797884583 : f32
    %35 = vector.broadcast %cst_18 : f32 to vector<16x32xf32>
    %36 = arith.mulf %35, %34 : vector<16x32xf32>
    %37 = math.tanh %36 : vector<16x32xf32>
    %cst_19 = arith.constant 1.000000e+00 : f32
    %38 = vector.broadcast %cst_19 : f32 to vector<16x32xf32>
    %39 = arith.addf %38, %37 : vector<16x32xf32>
    %40 = arith.mulf %29, %39 : vector<16x32xf32>
    %41 = arith.truncf %40 : vector<16x32xf32> to vector<16x32xbf16>
    %cst_20 = arith.constant dense<0.000000e+00> : vector<8x32xf32>
    %42 = tpu.matmul %1, %41, %cst_20 {dimension_numbers = #tpu.dot_dimension_numbers<[1], [0], [0], [1], [0, 0, 1, 1], [], []>} : vector<8x16xbf16>, vector<16x32xbf16>, vector<8x32xf32> -> vector<8x32xf32>
    %43 = arith.addf %42, %5 : vector<8x32xf32>
    %cst_21 = arith.constant dense<0.000000e+00> : vector<8xf32>
    %44 = vector.multi_reduction <add>, %43, %cst_21 [1] : vector<8x32xf32> to vector<8xf32>
    %45 = vector.shape_cast %44 : vector<8xf32> to vector<8x1xf32>
    %cst_22 = arith.constant 3.200000e+01 : f32
    %46 = vector.broadcast %cst_22 : f32 to vector<8x1xf32>
    %47 = arith.divf %45, %46 : vector<8x1xf32>
    %48 = arith.mulf %43, %43 : vector<8x32xf32>
    %cst_23 = arith.constant dense<0.000000e+00> : vector<8xf32>
    %49 = vector.multi_reduction <add>, %48, %cst_23 [1] : vector<8x32xf32> to vector<8xf32>
    %50 = vector.shape_cast %49 : vector<8xf32> to vector<8x1xf32>
    %cst_24 = arith.constant 3.200000e+01 : f32
    %51 = vector.broadcast %cst_24 : f32 to vector<8x1xf32>
    %52 = arith.divf %50, %51 : vector<8x1xf32>
    %53 = arith.mulf %47, %47 : vector<8x1xf32>
    %54 = arith.subf %52, %53 : vector<8x1xf32>
    %cst_25 = arith.constant 0.000000e+00 : f32
    %55 = vector.broadcast %cst_25 : f32 to vector<8x1xf32>
    %56 = arith.maximumf %54, %55 : vector<8x1xf32>
    %57 = vector.broadcast %47 : vector<8x1xf32> to vector<8x32xf32>
    %58 = arith.subf %43, %57 : vector<8x32xf32>
    %cst_26 = arith.constant 9.99999974E-6 : f32
    %59 = vector.broadcast %cst_26 : f32 to vector<8x1xf32>
    %60 = arith.addf %56, %59 : vector<8x1xf32>
    %61 = math.rsqrt %60 : vector<8x1xf32>
    %62 = vector.broadcast %61 : vector<8x1xf32> to vector<8x32xf32>
    %63 = arith.mulf %58, %62 : vector<8x32xf32>
    %64 = arith.truncf %63 : vector<8x32xf32> to vector<8x32xbf16>
    %cst_27 = arith.constant dense<0.000000e+00> : vector<8x64xf32>
    %65 = tpu.matmul %64, %2, %cst_27 {dimension_numbers = #tpu.dot_dimension_numbers<[1], [0], [0], [1], [0, 0, 1, 1], [], []>} : vector<8x32xbf16>, vector<32x64xbf16>, vector<8x64xf32> -> vector<8x64xf32>
    %cst_28 = arith.constant 5.000000e-01 : f32
    %66 = vector.broadcast %cst_28 : f32 to vector<8x64xf32>
    %67 = arith.mulf %66, %65 : vector<8x64xf32>
    %cst_29 = arith.constant 4.471500e-02 : f32
    %68 = vector.broadcast %cst_29 : f32 to vector<8x64xf32>
    %69 = arith.mulf %68, %65 : vector<8x64xf32>
    %70 = arith.mulf %69, %65 : vector<8x64xf32>
    %71 = arith.mulf %70, %65 : vector<8x64xf32>
    %72 = arith.addf %65, %71 : vector<8x64xf32>
    %cst_30 = arith.constant 0.797884583 : f32
    %73 = vector.broadcast %cst_30 : f32 to vector<8x64xf32>
    %74 = arith.mulf %73, %72 : vector<8x64xf32>
    %75 = math.tanh %74 : vector<8x64xf32>
    %cst_31 = arith.constant 1.000000e+00 : f32
    %76 = vector.broadcast %cst_31 : f32 to vector<8x64xf32>
    %77 = arith.addf %76, %75 : vector<8x64xf32>
    %78 = arith.mulf %67, %77 : vector<8x64xf32>
    %79 = arith.truncf %78 : vector<8x64xf32> to vector<8x64xbf16>
    %cst_32 = arith.constant dense<0.000000e+00> : vector<8x32xf32>
    %80 = tpu.matmul %79, %3, %cst_32 {dimension_numbers = #tpu.dot_dimension_numbers<[1], [0], [0], [1], [0, 0, 1, 1], [], []>} : vector<8x64xbf16>, vector<64x32xbf16>, vector<8x32xf32> -> vector<8x32xf32>
    %81 = arith.addf %80, %43 : vector<8x32xf32>
    %c0_33 = arith.constant 0 : index
    %c0_34 = arith.constant 0 : index
    %c0_35 = arith.constant 0 : index
    %82 = vector.load %arg6[%c0_33, %c0_34, %c0_35] : memref<2x8x32xf32, #tpu.memory_space<vmem>>, vector<1x8x32xf32>
    %83 = vector.shape_cast %82 : vector<1x8x32xf32> to vector<8x32xf32>
    %84 = vector.shape_cast %81 : vector<8x32xf32> to vector<1x8x32xf32>
    tpu.vector_store %arg6[%c0_33, %c0_34, %c0_35], %84 {strides = array<i32>} : memref<2x8x32xf32, #tpu.memory_space<vmem>>, vector<1x8x32xf32>,
    %c1 = arith.constant 1 : index
    %c0_36 = arith.constant 0 : index
    %c0_37 = arith.constant 0 : index
    %85 = vector.load %arg1[%c1, %c0_36, %c0_37] : memref<2x8x32xf32, #tpu.memory_space<vmem>>, vector<1x8x32xf32>
    %86 = vector.shape_cast %85 : vector<1x8x32xf32> to vector<8x32xf32>
    %cst_38 = arith.constant dense<0.000000e+00> : vector<8xf32>
    %87 = vector.multi_reduction <add>, %86, %cst_38 [1] : vector<8x32xf32> to vector<8xf32>
    %88 = vector.shape_cast %87 : vector<8xf32> to vector<8x1xf32>
    %cst_39 = arith.constant 3.200000e+01 : f32
    %89 = vector.broadcast %cst_39 : f32 to vector<8x1xf32>
    %90 = arith.divf %88, %89 : vector<8x1xf32>
    %91 = arith.mulf %86, %86 : vector<8x32xf32>
    %cst_40 = arith.constant dense<0.000000e+00> : vector<8xf32>
    %92 = vector.multi_reduction <add>, %91, %cst_40 [1] : vector<8x32xf32> to vector<8xf32>
    %93 = vector.shape_cast %92 : vector<8xf32> to vector<8x1xf32>
    %cst_41 = arith.constant 3.200000e+01 : f32
    %94 = vector.broadcast %cst_41 : f32 to vector<8x1xf32>
    %95 = arith.divf %93, %94 : vector<8x1xf32>
    %96 = arith.mulf %90, %90 : vector<8x1xf32>
    %97 = arith.subf %95, %96 : vector<8x1xf32>
    %cst_42 = arith.constant 0.000000e+00 : f32
    %98 = vector.broadcast %cst_42 : f32 to vector<8x1xf32>
    %99 = arith.maximumf %97, %98 : vector<8x1xf32>
    %100 = vector.broadcast %90 : vector<8x1xf32> to vector<8x32xf32>
    %101 = arith.subf %86, %100 : vector<8x32xf32>
    %cst_43 = arith.constant 9.99999974E-6 : f32
    %102 = vector.broadcast %cst_43 : f32 to vector<8x1xf32>
    %103 = arith.addf %99, %102 : vector<8x1xf32>
    %104 = math.rsqrt %103 : vector<8x1xf32>
    %105 = vector.broadcast %104 : vector<8x1xf32> to vector<8x32xf32>
    %106 = arith.mulf %101, %105 : vector<8x32xf32>
    %107 = arith.truncf %106 : vector<8x32xf32> to vector<8x32xbf16>
    %cst_44 = arith.constant dense<0.000000e+00> : vector<16x32xf32>
    %108 = tpu.matmul %0, %107, %cst_44 {dimension_numbers = #tpu.dot_dimension_numbers<[1], [0], [0], [1], [0, 0, 1, 1], [], []>} : vector<16x8xbf16>, vector<8x32xbf16>, vector<16x32xf32> -> vector<16x32xf32>
    %cst_45 = arith.constant 5.000000e-01 : f32
    %109 = vector.broadcast %cst_45 : f32 to vector<16x32xf32>
    %110 = arith.mulf %109, %108 : vector<16x32xf32>
    %cst_46 = arith.constant 4.471500e-02 : f32
    %111 = vector.broadcast %cst_46 : f32 to vector<16x32xf32>
    %112 = arith.mulf %111, %108 : vector<16x32xf32>
    %113 = arith.mulf %112, %108 : vector<16x32xf32>
    %114 = arith.mulf %113, %108 : vector<16x32xf32>
    %115 = arith.addf %108, %114 : vector<16x32xf32>
    %cst_47 = arith.constant 0.797884583 : f32
    %116 = vector.broadcast %cst_47 : f32 to vector<16x32xf32>
    %117 = arith.mulf %116, %115 : vector<16x32xf32>
    %118 = math.tanh %117 : vector<16x32xf32>
    %cst_48 = arith.constant 1.000000e+00 : f32
    %119 = vector.broadcast %cst_48 : f32 to vector<16x32xf32>
    %120 = arith.addf %119, %118 : vector<16x32xf32>
    %121 = arith.mulf %110, %120 : vector<16x32xf32>
    %122 = arith.truncf %121 : vector<16x32xf32> to vector<16x32xbf16>
    %cst_49 = arith.constant dense<0.000000e+00> : vector<8x32xf32>
    %123 = tpu.matmul %1, %122, %cst_49 {dimension_numbers = #tpu.dot_dimension_numbers<[1], [0], [0], [1], [0, 0, 1, 1], [], []>} : vector<8x16xbf16>, vector<16x32xbf16>, vector<8x32xf32> -> vector<8x32xf32>
    %124 = arith.addf %123, %86 : vector<8x32xf32>
    %cst_50 = arith.constant dense<0.000000e+00> : vector<8xf32>
    %125 = vector.multi_reduction <add>, %124, %cst_50 [1] : vector<8x32xf32> to vector<8xf32>
    %126 = vector.shape_cast %125 : vector<8xf32> to vector<8x1xf32>
    %cst_51 = arith.constant 3.200000e+01 : f32
    %127 = vector.broadcast %cst_51 : f32 to vector<8x1xf32>
    %128 = arith.divf %126, %127 : vector<8x1xf32>
    %129 = arith.mulf %124, %124 : vector<8x32xf32>
    %cst_52 = arith.constant dense<0.000000e+00> : vector<8xf32>
    %130 = vector.multi_reduction <add>, %129, %cst_52 [1] : vector<8x32xf32> to vector<8xf32>
    %131 = vector.shape_cast %130 : vector<8xf32> to vector<8x1xf32>
    %cst_53 = arith.constant 3.200000e+01 : f32
    %132 = vector.broadcast %cst_53 : f32 to vector<8x1xf32>
    %133 = arith.divf %131, %132 : vector<8x1xf32>
    %134 = arith.mulf %128, %128 : vector<8x1xf32>
    %135 = arith.subf %133, %134 : vector<8x1xf32>
    %cst_54 = arith.constant 0.000000e+00 : f32
    %136 = vector.broadcast %cst_54 : f32 to vector<8x1xf32>
    %137 = arith.maximumf %135, %136 : vector<8x1xf32>
    %138 = vector.broadcast %128 : vector<8x1xf32> to vector<8x32xf32>
    %139 = arith.subf %124, %138 : vector<8x32xf32>
    %cst_55 = arith.constant 9.99999974E-6 : f32
    %140 = vector.broadcast %cst_55 : f32 to vector<8x1xf32>
    %141 = arith.addf %137, %140 : vector<8x1xf32>
    %142 = math.rsqrt %141 : vector<8x1xf32>
    %143 = vector.broadcast %142 : vector<8x1xf32> to vector<8x32xf32>
    %144 = arith.mulf %139, %143 : vector<8x32xf32>
    %145 = arith.truncf %144 : vector<8x32xf32> to vector<8x32xbf16>
    %cst_56 = arith.constant dense<0.000000e+00> : vector<8x64xf32>
    %146 = tpu.matmul %145, %2, %cst_56 {dimension_numbers = #tpu.dot_dimension_numbers<[1], [0], [0], [1], [0, 0, 1, 1], [], []>} : vector<8x32xbf16>, vector<32x64xbf16>, vector<8x64xf32> -> vector<8x64xf32>
    %cst_57 = arith.constant 5.000000e-01 : f32
    %147 = vector.broadcast %cst_57 : f32 to vector<8x64xf32>
    %148 = arith.mulf %147, %146 : vector<8x64xf32>
    %cst_58 = arith.constant 4.471500e-02 : f32
    %149 = vector.broadcast %cst_58 : f32 to vector<8x64xf32>
    %150 = arith.mulf %149, %146 : vector<8x64xf32>
    %151 = arith.mulf %150, %146 : vector<8x64xf32>
    %152 = arith.mulf %151, %146 : vector<8x64xf32>
    %153 = arith.addf %146, %152 : vector<8x64xf32>
    %cst_59 = arith.constant 0.797884583 : f32
    %154 = vector.broadcast %cst_59 : f32 to vector<8x64xf32>
    %155 = arith.mulf %154, %153 : vector<8x64xf32>
    %156 = math.tanh %155 : vector<8x64xf32>
    %cst_60 = arith.constant 1.000000e+00 : f32
    %157 = vector.broadcast %cst_60 : f32 to vector<8x64xf32>
    %158 = arith.addf %157, %156 : vector<8x64xf32>
    %159 = arith.mulf %148, %158 : vector<8x64xf32>
    %160 = arith.truncf %159 : vector<8x64xf32> to vector<8x64xbf16>
    %cst_61 = arith.constant dense<0.000000e+00> : vector<8x32xf32>
    %161 = tpu.matmul %160, %3, %cst_61 {dimension_numbers = #tpu.dot_dimension_numbers<[1], [0], [0], [1], [0, 0, 1, 1], [], []>} : vector<8x64xbf16>, vector<64x32xbf16>, vector<8x32xf32> -> vector<8x32xf32>
    %162 = arith.addf %161, %124 : vector<8x32xf32>
    %c1_62 = arith.constant 1 : index
    %c0_63 = arith.constant 0 : index
    %c0_64 = arith.constant 0 : index
    %163 = vector.load %arg6[%c1_62, %c0_63, %c0_64] : memref<2x8x32xf32, #tpu.memory_space<vmem>>, vector<1x8x32xf32>
    %164 = vector.shape_cast %163 : vector<1x8x32xf32> to vector<8x32xf32>
    %165 = vector.shape_cast %162 : vector<8x32xf32> to vector<1x8x32xf32>
    tpu.vector_store %arg6[%c1_62, %c0_63, %c0_64], %165 {strides = array<i32>} : memref<2x8x32xf32, #tpu.memory_space<vmem>>, vector<1x8x32xf32>,
    return
  }
  func.func @transform_0(%arg0: i32) -> (i32, i32, i32) {
    %c0_i32 = arith.constant 0 : i32
    %c0_i32_0 = arith.constant 0 : i32
    %c0_i32_1 = arith.constant 0 : i32
    return %arg0, %c0_i32, %c0_i32_0 : i32, i32, i32
  }
  func.func @transform_1(%arg0: i32) -> (i32, i32) {
    %c0_i32 = arith.constant 0 : i32
    %c0_i32_0 = arith.constant 0 : i32
    %c0_i32_1 = arith.constant 0 : i32
    return %c0_i32, %c0_i32_0 : i32, i32
  }
  func.func @transform_2(%arg0: i32) -> (i32, i32) {
    %c0_i32 = arith.constant 0 : i32
    %c0_i32_0 = arith.constant 0 : i32
    %c0_i32_1 = arith.constant 0 : i32
    return %c0_i32, %c0_i32_0 : i32, i32
  }
  func.func @transform_3(%arg0: i32) -> (i32, i32) {
    %c0_i32 = arith.constant 0 : i32
    %c0_i32_0 = arith.constant 0 : i32
    %c0_i32_1 = arith.constant 0 : i32
    return %c0_i32, %c0_i32_0 : i32, i32
  }
  func.func @transform_4(%arg0: i32) -> (i32, i32) {
    %c0_i32 = arith.constant 0 : i32
    %c0_i32_0 = arith.constant 0 : i32
    %c0_i32_1 = arith.constant 0 : i32
    return %c0_i32, %c0_i32_0 : i32, i32
  }
  func.func @transform_5(%arg0: i32) -> (i32, i32, i32) {
    %c0_i32 = arith.constant 0 : i32
    %c0_i32_0 = arith.constant 0 : i32
    %c0_i32_1 = arith.constant 0 : i32
    return %arg0, %c0_i32, %c0_i32_0 : i32, i32, i32
  }
}

</mosaic_0001>

<bundles_post_ra>
// kernel: tpu_custom_call.1
= control target key start
LH: loop header
LB: loop body
LE: loop exit
PB: predicated region body
PF: predicated region fallthrough
CT: control target
= control target key end

     0   :  { %vm38_vm0 = vcmask 261120   ;;  %s897_s0 = inlined_call_operand.vmem [shape: f32[2,8,32], index: 0, kind: input, shape index: {}]   ;;  %s898_s1 = inlined_call_operand.vmem [shape: bf16[16,8], index: 1, kind: input, shape index: {}]   ;;  %s899_s2 = inlined_call_operand.vmem [shape: bf16[8,16], index: 2, kind: input, shape index: {}]   ;;  %s900_s3 = inlined_call_operand.vmem [shape: bf16[32,64], index: 3, kind: input, shape index: {}]   ;;  %s901_s4 = inlined_call_operand.vmem [shape: bf16[64,32], index: 4, kind: input, shape index: {}]   ;;  %s902_s5 = inlined_call_operand.hbm [shape: f32[2,8,32], index: 5, kind: output, shape index: {}]  }
   0x1   :  { %v776_v0 = vld [vmem:[%s897_s0] sm:$0xff]  ;;  %v781_v1 = vld [vmem:[%s897_s0 + $0x8] sm:$0xff] }
   0x2   :  { %v39_v2 = vsel %vm38_vm0, %v776_v0, 0.0  ;;  %v44_v3 = vmul.f32 %v776_v0, %v776_v0  ;;  %v327_v4 = vsel %vm38_vm0, %v781_v1, 0.0  ;;  %v331_v5 = vmul.f32 %v781_v1, %v781_v1 }
   0x3   :  { %40 = vadd.xlane.f32.xlu0 %v39_v2  ;;  %328 = vadd.xlane.f32.xlu1 %v327_v4 }
   0x4   :  { %v45_v6 = vsel %vm38_vm0, %v44_v3, 0.0  ;;  %v332_v7 = vsel %vm38_vm0, %v331_v5, 0.0 }
   0x7   :  { %46 = vadd.xlane.f32.xlu0 %v45_v6  ;;  %333 = vadd.xlane.f32.xlu1 %v332_v7 }
   0x8   :  { %10 = vsyncpa [#allocation3], 0  ;;  %v738_v8 = vmov 0.0   ;;  %vm739_vm1 = vmmov 0   ;;  %vm66_vm2 = vcmask 1043456   ;;  %v687_v34 = vld [vmem:[%s898_s1] sm:$0xff]  }
   0x9   :  { %618 = vmatprep.subr.bf16.mxu0 %v738_v8  ;;  %624 = vmatprep.subr.bf16.mxu1 %v738_v8  ;;  %vm62_vm3 = vcmask 64512   ;;  %vm130_vm4 = vcmask 130048   ;;  %vm280_vm5 = vcmask 523264  }
   0xa   :  { %620 = vmatprep.mubr.msk.bf16.mxu0 %vm739_vm1, %v738_v8  ;;  %626 = vmatprep.mubr.msk.bf16.mxu1 %vm739_vm1, %v738_v8 }
  0x90   :  { %v41_v9 = vpop.xlane.xlu0 %40  ;;  %v329_v10 = vpop.xlane.xlu1 %328 }
  0x91   :  { %v43_v11 = vmul.f32 0.03125, %v41_v9  ;;  %v330_v12 = vmul.f32 0.03125, %v329_v10 }
  0x93   :  { %v336_v13 = vmul.f32 %v330_v12, %v330_v12  ;;  %v49_v16 = vmul.f32 %v43_v11, %v43_v11  ;;  %v339_v25 = vsub.f32 %v781_v1, %v330_v12  ;;  %v52_v26 = vsub.f32 %v776_v0, %v43_v11 }
  0x94   :  { %v47_v14 = vpop.xlane.xlu0 %46  ;;  %v334_v15 = vpop.xlane.xlu1 %333 }
  0x95   :  { %v48_v17 = vmul.f32 0.03125, %v47_v14  ;;  %v335_v18 = vmul.f32 0.03125, %v334_v15  ;;  %v24_v14 = vld [vmem:[%s899_s2] sm:$0xf] }
  0x97   :  { %v50_v19 = vsub.f32 %v48_v17, %v49_v16  ;;  %v337_v20 = vsub.f32 %v335_v18, %v336_v13 }
  0x99   :  { %v51_v21 = vmax.f32 %v50_v19, 0.0  ;;  %v338_v22 = vmax.f32 %v337_v20, 0.0 }
  0x9b   :  { %v53_v23 = vadd.f32 1e-05, %v51_v21  ;;  %v340_v24 = vadd.f32 1e-05, %v338_v22 }
  0x9d   :  { %694 = vrsqrt.f32 %v53_v23 }
  0x9e   :  { %696 = vrsqrt.f32 %v340_v24 }
  0xa7   :  { %v695_v27 = vpop.eup %694 }
  0xa8   :  { %v697_v28 = vpop.eup %696  ;;  %v55_v29 = vmul.f32 %v695_v27, %v52_v26 }
  0xa9   :  { %v342_v30 = vmul.f32 %v697_v28, %v339_v25 }
  0xaa   :  { %v56_v31 = vpack.c.bf16 %v55_v29, %v55_v29 }
  0xab   :  { %v343_v32 = vpack.c.bf16 %v342_v30, %v342_v30 }
  0xac   :  { %v68_v33 = vsel %vm66_vm2, %v56_v31, 0 }
  0xad   :  { %619 = vmatpush3.bf16.msra.mxu0 %v68_v33  ;;  %v345_v35 = vsel %vm66_vm2, %v343_v32, 0 }
  0xae   :  { %650 = vmatprep.subr.bf16.mxu0 %v738_v8 }
  0xb0   :  { %621 = vmatmul.mubr.msk.bf16.vlgmr.msra.gmra.mrb[0].mxu0 %vm62_vm3, %v687_v34 }
  0xb1   :  { %651 = vmatpush3.bf16.msra.mxu0 %v345_v35  ;;  %652 = vmatprep.mubr.msk.bf16.mxu0 %vm739_vm1, %v738_v8 }
  0xb2   :  { %656 = vmatprep.subr.bf16.mxu0 %v738_v8 }
  0xb8   :  { %653 = vmatmul.mubr.msk.bf16.vlgmr.msra.gmra.mrb[4].mxu0 %vm62_vm3, %v687_v34 }
  0xb9   :  { %658 = vmatprep.mubr.msk.bf16.mxu0 %vm739_vm1, %v738_v8 }
 0x183   :  { %v104_v36 = vpop.f32.mrb[0].mxu0 }
 0x184   :  { %v113_v37 = vmul.f32 0.044715, %v104_v36  ;;  %v622_v38 = vpop.f32.mrb[1].mxu0  ;;  %v111_v5 = vmul.f32 0.5, %v104_v36 }
 0x185   :  { %v107_v39 = vpop.f32.mrb[2].mxu0 }
 0x186   :  { %v115_v40 = vmul.f32 %v113_v37, %v104_v36  ;;  %v114_v41 = vmul.f32 0.044715, %v107_v39  ;;  %v623_v42 = vpop.f32.mrb[3].mxu0  ;;  %v112_v6 = vmul.f32 0.5, %v107_v39  ;;  %v838_v37 = vld [vmem:[%s900_s3] sm:$0xff]  }
 0x188   :  { %v117_v43 = vmul.f32 %v115_v40, %v104_v36  ;;  %v116_v44 = vmul.f32 %v114_v41, %v107_v39 }
 0x18a   :  { %v119_v45 = vadd.f32 %v117_v43, %v104_v36  ;;  %v118_v46 = vmul.f32 %v116_v44, %v107_v39 }
 0x18b   :  { %v381_v47 = vpop.f32.mrb[4].mxu0 }
 0x18c   :  { %v120_v48 = vadd.f32 %v118_v46, %v107_v39  ;;  %v121_v49 = vmul.f32 0.7978846, %v119_v45  ;;  %v390_v50 = vmul.f32 0.044715, %v381_v47  ;;  %v654_v51 = vpop.f32.mrb[5].mxu0  ;;  %v388_v13 = vmul.f32 0.5, %v381_v47 }
 0x18d   :  { %v384_v52 = vpop.f32.mrb[6].mxu0  ;;  %v691_v51 = vld [vmem:[%s901_s4 + $0x8] sm:$0xff]  }
 0x18e   :  { %v122_v53 = vmul.f32 0.7978846, %v120_v48  ;;  %698 = vtanh.f32 %v121_v49  ;;  %v392_v54 = vmul.f32 %v390_v50, %v381_v47  ;;  %v655_v55 = vpop.f32.mrb[7].mxu0  ;;  %v391_v56 = vmul.f32 0.044715, %v384_v52  ;;  %v690_v50 = vld [vmem:[%s901_s4] sm:$0xff]  }
 0x18f   :  { %v389_v16 = vmul.f32 0.5, %v384_v52 }
 0x190   :  { %700 = vtanh.f32 %v122_v53  ;;  %v394_v57 = vmul.f32 %v392_v54, %v381_v47  ;;  %v393_v58 = vmul.f32 %v391_v56, %v384_v52  ;;  %v693_v53 = vld [vmem:[%s901_s4 + $0x18] sm:$0xff]  }
 0x192   :  { %v396_v59 = vadd.f32 %v394_v57, %v381_v47  ;;  %v395_v60 = vmul.f32 %v393_v58, %v384_v52 }
 0x194   :  { %v398_v61 = vmul.f32 0.7978846, %v396_v59  ;;  %v397_v62 = vadd.f32 %v395_v60, %v384_v52  ;;  %v692_v52 = vld [vmem:[%s901_s4 + $0x10] sm:$0xff]   ;;  %s740_s4 = smov [#allocation2]  }
 0x195   :  { %s567_s9 = sshll.u32 %s740_s4, 4  ;;  %s568_s9 = int_to_ptr.vmem [resolvable:$true] %s567_s9 }
 0x196   :  { %702 = vtanh.f32 %v398_v61  ;;  %v399_v63 = vmul.f32 0.7978846, %v397_v62  ;;  %s714_s10 = scalar_lea.vmem %s568_s9, 256  ;;  %p719_p1 = scmp.lt.s32.totalorder %s568_s9, %s568_s9 }
 0x197   :  { %p715_p0 = scmp.ne.s32.totalorder %s568_s9, %s714_s10  ;;  %p720_p2 = scmp.lt.s32.totalorder %s714_s10, %s714_s10 }
 0x198   :  { %v699_v2 = vpop.eup %698  ;;  %704 = vtanh.f32 %v399_v63 }
 0x199   :  { %v125_v3 = vadd.f32 1.0, %v699_v2  ;;  %p721_p3 = por %p720_p2, %p719_p1 }
 0x19a   :  { %v701_v4 = vpop.eup %700 }
 0x19b   :  { %v126_v7 = vadd.f32 1.0, %v701_v4  ;;  %v127_v9 = vmul.f32 %v125_v3, %v111_v5  ;;  %p722_p4 = pnand %p721_p3, %p715_p0 }
 0x19d   :  { %v128_v10 = vmul.f32 %v126_v7, %v112_v6 }
 0x19f   :  { %v129_v11 = vpack.c.bf16 %v128_v10, %v127_v9 }
 0x1a0   :  { %v703_v12 = vpop.eup %702 }
 0x1a1   :  { %625 = vmatpush3.bf16.msra.mxu1 %v129_v11  ;;  %v402_v15 = vadd.f32 1.0, %v703_v12 }
 0x1a2   :  { %630 = vmatprep.subr.bf16.mxu1 %v738_v8  ;;  %v705_v17 = vpop.eup %704 }
 0x1a3   :  { %v403_v18 = vadd.f32 1.0, %v705_v17  ;;  %v404_v19 = vmul.f32 %v402_v15, %v388_v13 }
 0x1a4   :  { %627 = vmatmul.mubr.msk.bf16.vlgmr.msra.gmra.mrb[0].mxu1 %vm130_vm4, %v24_v14 }
 0x1a5   :  { %634 = vmatprep.mubr.msk.bf16.mxu1 %vm739_vm1, %v738_v8  ;;  %v405_v20 = vmul.f32 %v403_v18, %v389_v16  ;;  %631 = vmatpush3.bf16.msra.mxu1 %v838_v37 }
 0x1a6   :  { %632 = vmatprep.subr.bf16.mxu1 %v738_v8 }
 0x1a7   :  { %v406_v21 = vpack.c.bf16 %v405_v20, %v404_v19 }
 0x1a9   :  { %657 = vmatpush3.bf16.msra.mxu0 %v406_v21 }
 0x1aa   :  { %670 = vmatprep.subr.bf16.mxu0 %v738_v8 }
 0x1ac   :  { %659 = vmatmul.mubr.msk.bf16.vlgmr.msra.gmra.mrb[8].mxu0 %vm130_vm4, %v24_v14 }
 0x1ad   :  { %678 = vmatprep.mubr.msk.bf16.mxu0 %vm739_vm1, %v738_v8  ;;  %671 = vmatpush3.bf16.msra.mxu0 %v690_v50 }
 0x1ae   :  { %672 = vmatprep.subr.bf16.mxu0 %v738_v8 }
 0x1b1   :  { %673 = vmatpush3.bf16.msra.mxu0 %v691_v51 }
 0x1b2   :  { %674 = vmatprep.subr.bf16.mxu0 %v738_v8 }
 0x1b5   :  { %675 = vmatpush3.bf16.msra.mxu0 %v692_v52 }
 0x1b6   :  { %676 = vmatprep.subr.bf16.mxu0 %v738_v8 }
 0x1b9   :  { %677 = vmatpush3.bf16.msra.mxu0 %v693_v53 }
 0x277   :  { %v168_v22 = vpop.f32.mrb[0].mxu1 }
 0x278   :  { %v820_v23 = vadd.f32 %v168_v22, %v776_v0  ;;  %v628_v24 = vpop.f32.mrb[1].mxu1 }
 0x279   :  { %v171_v25 = vpop.f32.mrb[2].mxu1 }
 0x27a   :  { %v629_v26 = vpop.f32.mrb[3].mxu1  ;;  %v174_v27 = vsel %vm38_vm0, %v820_v23, 0.0  ;;  %v178_v28 = vmul.f32 %v820_v23, %v820_v23 }
 0x27b   :  { %175 = vadd.xlane.f32.xlu0 %v174_v27 }
 0x27c   :  { %v179_v29 = vsel %vm38_vm0, %v178_v28, 0.0 }
 0x27d   :  { %180 = vadd.xlane.f32.xlu1 %v179_v29 }
 0x27f   :  { %v441_v30 = vpop.f32.mrb[8].mxu0 }
 0x280   :  { %v828_v31 = vadd.f32 %v781_v1, %v441_v30  ;;  %v660_v32 = vpop.f32.mrb[9].mxu0  ;;  %v844_v1 = vld [vmem:[%s900_s3 + $0x8] sm:$0xff]  }
 0x281   :  { %v444_v0 = vpop.f32.mrb[10].mxu0  ;;  %633 = vmatpush3.bf16.msra.mxu1 %v844_v1 }
 0x282   :  { %v447_v33 = vsel %vm38_vm0, %v828_v31, 0.0  ;;  %v451_v34 = vmul.f32 %v828_v31, %v828_v31  ;;  %v661_v35 = vpop.f32.mrb[11].mxu0  ;;  %638 = vmatprep.subr.bf16.mxu1 %v738_v8 }
 0x283   :  { %448 = vadd.xlane.f32.xlu0 %v447_v33 }
 0x284   :  { %v452_v36 = vsel %vm38_vm0, %v451_v34, 0.0 }
 0x285   :  { %453 = vadd.xlane.f32.xlu1 %v452_v36 }
 0x308   :  { %v176_v38 = vpop.xlane.xlu0 %175 }
 0x309   :  { %v177_v39 = vmul.f32 0.03125, %v176_v38 }
 0x30a   :  { %v181_v40 = vpop.xlane.xlu1 %180 }
 0x30b   :  { %v183_v41 = vmul.f32 %v177_v39, %v177_v39  ;;  %v182_v42 = vmul.f32 0.03125, %v181_v40  ;;  %v186_v46 = vsub.f32 %v820_v23, %v177_v39 }
 0x30d   :  { %v184_v43 = vsub.f32 %v182_v42, %v183_v41 }
 0x30f   :  { %v185_v44 = vmax.f32 %v184_v43, 0.0 }
 0x310   :  { %v449_v54 = vpop.xlane.xlu0 %448 }
 0x311   :  { %v187_v45 = vadd.f32 1e-05, %v185_v44  ;;  %v450_v55 = vmul.f32 0.03125, %v449_v54 }
 0x312   :  { %v454_v56 = vpop.xlane.xlu1 %453 }
 0x313   :  { %706 = vrsqrt.f32 %v187_v45  ;;  %v456_v58 = vmul.f32 %v450_v55, %v450_v55  ;;  %v455_v59 = vmul.f32 0.03125, %v454_v56  ;;  %v459_v14 = vsub.f32 %v828_v31, %v450_v55 }
 0x315   :  { %v457_v3 = vsub.f32 %v455_v59, %v456_v58 }
 0x317   :  { %v458_v6 = vmax.f32 %v457_v3, 0.0 }
 0x319   :  { %v460_v9 = vadd.f32 1e-05, %v458_v6 }
 0x31d   :  { %v707_v47 = vpop.eup %706 }
 0x31e   :  { %v189_v48 = vmul.f32 %v707_v47, %v186_v46 }
 0x320   :  { %v190_v49 = vpack.c.bf16 %v189_v48, %v189_v48 }
 0x322   :  { %635 = vmatmul.mubr.msk.bf16.vlgmr.msra.gmra.mrb[4].mxu1 %vm38_vm0, %v190_v49 }
 0x323   :  { %646 = vmatprep.mubr.msk.bf16.mxu1 %vm739_vm1, %v738_v8  ;;  %639 = vmatpush3.bf16.msra.mxu1 %v690_v50 }
 0x324   :  { %640 = vmatprep.subr.bf16.mxu1 %v738_v8 }
 0x327   :  { %641 = vmatpush3.bf16.msra.mxu1 %v691_v51 }
 0x328   :  { %642 = vmatprep.subr.bf16.mxu1 %v738_v8 }
 0x32b   :  { %643 = vmatpush3.bf16.msra.mxu1 %v692_v52 }
 0x32c   :  { %644 = vmatprep.subr.bf16.mxu1 %v738_v8 }
 0x32f   :  { %645 = vmatpush3.bf16.msra.mxu1 %v693_v53 }
 0x330   :  { %662 = vmatprep.subr.bf16.mxu1 %v738_v8 }
 0x3f5   :  { %v240_v57 = vpop.f32.mrb[4].mxu1 }
 0x3f6   :  { %v247_v60 = vmul.f32 0.044715, %v240_v57  ;;  %v636_v61 = vpop.f32.mrb[5].mxu1  ;;  %v246_v11 = vmul.f32 0.5, %v240_v57 }
 0x3f7   :  { %v243_v62 = vpop.f32.mrb[6].mxu1 }
 0x3f8   :  { %v248_v63 = vmul.f32 %v247_v60, %v240_v57  ;;  %v637_v2 = vpop.f32.mrb[7].mxu1 }
 0x3fa   :  { %v249_v4 = vmul.f32 %v248_v63, %v240_v57 }
 0x3fc   :  { %v250_v5 = vadd.f32 %v249_v4, %v240_v57 }
 0x3fe   :  { %v251_v7 = vmul.f32 0.7978846, %v250_v5 }
 0x400   :  { %708 = vtanh.f32 %v251_v7 }
 0x401   :  { %710 = vrsqrt.f32 %v460_v9 }
 0x40a   :  { %v709_v10 = vpop.eup %708 }
 0x40b   :  { %v253_v12 = vadd.f32 1.0, %v709_v10  ;;  %v711_v16 = vpop.eup %710 }
 0x40c   :  { %v462_v17 = vmul.f32 %v711_v16, %v459_v14 }
 0x40d   :  { %v254_v13 = vmul.f32 %v253_v12, %v246_v11 }
 0x40e   :  { %v463_v18 = vpack.c.bf16 %v462_v17, %v462_v17 }
 0x40f   :  { %v255_v15 = vpack.c.bf16 %v254_v13, %v254_v13 }
 0x411   :  { %647 = vmatmul.mubr.msk.bf16.vlgmr.msra.gmra.mrb[8].mxu1 %vm280_vm5, %v255_v15 }
 0x412   :  { %663 = vmatpush3.bf16.msra.mxu1 %v838_v37  ;;  %666 = vmatprep.mubr.msk.bf16.mxu1 %vm739_vm1, %v738_v8 }
 0x413   :  { %664 = vmatprep.subr.bf16.mxu1 %v738_v8 }
 0x416   :  { %665 = vmatpush3.bf16.msra.mxu1 %v844_v1 }
 0x419   :  { %667 = vmatmul.mubr.msk.bf16.vlgmr.msra.gmra.mrb[12].mxu1 %vm38_vm0, %v463_v18 }
 0x4e4   :  { %v318_v19 = vpop.f32.mrb[8].mxu1 }
 0x4e5   :  { %v319_v20 = vadd.f32 %v318_v19, %v820_v23  ;;  %v648_v21 = vpop.f32.mrb[9].mxu1 }
 0x4e6   :  { %v321_v22 = vpop.f32.mrb[10].mxu1 }
 0x4e7   :  { %324 = vst.msk [vmem:[#allocation2] sm:$0xff] %vm38_vm0, %v319_v20  ;;  %v649_v24 = vpop.f32.mrb[11].mxu1 }
 0x4ec   :  { %v501_v25 = vpop.f32.mrb[12].mxu1 }
 0x4ed   :  { %v508_v26 = vmul.f32 0.044715, %v501_v25  ;;  %v668_v27 = vpop.f32.mrb[13].mxu1  ;;  %v507_v34 = vmul.f32 0.5, %v501_v25 }
 0x4ee   :  { %v504_v28 = vpop.f32.mrb[14].mxu1 }
 0x4ef   :  { %v509_v29 = vmul.f32 %v508_v26, %v501_v25  ;;  %v669_v8 = vpop.f32.mrb[15].mxu1 }
 0x4f1   :  { %v510_v30 = vmul.f32 %v509_v29, %v501_v25 }
 0x4f3   :  { %v511_v32 = vadd.f32 %v510_v30, %v501_v25 }
 0x4f5   :  { %v512_v0 = vmul.f32 0.7978846, %v511_v32 }
 0x4f7   :  { %712 = vtanh.f32 %v512_v0 }
 0x501   :  { %v713_v33 = vpop.eup %712 }
 0x502   :  { %v514_v35 = vadd.f32 1.0, %v713_v33 }
 0x504   :  { %v515_v36 = vmul.f32 %v514_v35, %v507_v34 }
 0x506   :  { %v516_v23 = vpack.c.bf16 %v515_v36, %v515_v36 }
 0x508   :  { %679 = vmatmul.mubr.msk.bf16.vlgmr.msra.gmra.mrb[12].mxu0 %vm280_vm5, %v516_v23 }
 0x5db   :  { %v554_v37 = vpop.f32.mrb[12].mxu0 }
 0x5dc   :  { %v555_v1 = vadd.f32 %v554_v37, %v828_v31  ;;  %v680_v38 = vpop.f32.mrb[13].mxu0 }
 0x5dd   :  { %v557_v39 = vpop.f32.mrb[14].mxu0 }
 0x5de   :  { %561 = vst.msk [vmem:[#allocation2 + $0x8] sm:$0xff] %vm38_vm0, %v555_v1  ;;  %v681_v40 = vpop.f32.mrb[15].mxu0 }
 0x5df   :  { %725 = shalt.err (!%p722_p4)
}
 0x5e0   :  { %s726_s13 = scalar_lea.hbm %s902_s5, 256 }
 0x5e1   :  { %p727_p5 = scmp.ne.s32.totalorder %s902_s5, %s726_s13  ;;  %p730_p6 = scmp.lt.u32.totalorder %s726_s13, %s902_s5 }
 0x5e3   :  { %p732_p7 = pnand %p730_p6, %p727_p5 }
 0x5e5   :  { %735 = shalt.err (!%p732_p7)
}
 0x5e6   :  { %s741_s18 = smov 128   ;;  %s742_s19 = smov 8  }
 0x5e7   :  { %573 = dma.vmem_to_hbm [thread:$0]  %s568_s9, 256, %s902_s5, [#allocation3], %s741_s18, %s741_s18, %s742_s19  }
 0x5e8   :  { %736 = dma.done.wait [#allocation3], 256  }
 0x5e9   :  { %737 = vsyncadd [#allocation3], 4294967040 }
 0x5ea   :  { %577 = vsyncpa [#allocation3], 1 }

</bundles_post_ra>
